<compile_context>
chip_gen: v7x
topology: tpu7x:2x2x1
jax: 0.10.0
libtpu: 0.0.40
codegen_flags: <defaults>
</compile_context>

<pallas_src>
import functools

import jax
import jax.numpy as jnp
from jax.experimental import pallas as pl
from jax.experimental.pallas import tpu as pltpu

# ---- synthetic "args" (small, consistent with the module's shape constraints) ----
VOCAB = 64          # synthetic vocab for the encoder stub
DIM = 32            # args.embedding_dim == encoder hidden size (must match, as in fc3(msg))
CO = 16             # args.num_filters
KS = (1, 2, 3)      # args.filter_sizes (len==3 required: fc3 out = 3*Co, fc1 in = 2*len(Ks)*Co)
HIDDEN = 32         # args.hidden_units
NUM_CLASS = 1       # args.class_num
BATCH = 2
NUM_FILE = 4        # number of code files (conv "length" axis)
SEQ = 8             # token sequence length per message / file

KMAX = max(KS)
NKS = len(KS)
OUT_PAD = 128       # lane-dense padded width of the kernel output (fc2 is only 1 wide)


def _round8(n):
    return -(-n // 8) * 8


# ---------------- static layout of the packed weight slab ----------------
# Every weight/bias lives at a fixed, 8-aligned row offset of one (R, 128) f32 slab.
def _build_layout():
    specs = [
        ("pool_w",    (DIM, DIM)),
        ("pool_b",    (1, DIM)),
        ("fc3_w",     (DIM, NKS * CO)),
        ("fc3_b",     (1, NKS * CO)),
        ("wconv",     (KMAX * DIM, NKS * CO)),
        ("conv_b",    (1, NKS * CO)),
        ("tmask",     (NUM_FILE, NKS * CO)),
        ("fc1w_msg",  (NKS * CO, HIDDEN)),
        ("fc1w_code", (NKS * CO, HIDDEN)),
        ("fc1_b",     (1, HIDDEN)),
        ("fc2_w",     (HIDDEN, OUT_PAD)),
        ("fc2_b",     (1, OUT_PAD)),
    ]
    layout, r = {}, 0
    for name, (h, w) in specs:
        layout[name] = (r, h, w)
        r += _round8(h)
    return layout, r


_WLAYOUT, _WROWS = _build_layout()


def _vmem():
    # tiny arrays -> whole-array blocks resident in VMEM, no grid
    return pl.BlockSpec(memory_space=pltpu.MemorySpace.VMEM)


# ---------------- the single fused Pallas kernel ----------------

def _fused_kernel(emb_ref, mask_ref, wslab_ref, o_ref, *,
                  B, NF, D, Co, n_ks, kmax, msg_rows):
    f32 = jnp.float32
    n_code = B * NF

    def w(name):
        r0, h, wd = _WLAYOUT[name]
        return wslab_ref[r0:r0 + h, :wd]          # static ref view -> targeted load

    # ---- encoder stub: masked mean pool + tanh(dense) on the combined code+msg slab ----
    emb = emb_ref[...]                            # (n_code + msg_rows, S, D)
    mask = mask_ref[...]                          # (n_code + msg_rows, S) float32
    summed = jnp.sum(emb * mask[:, :, None], axis=1)              # (N, D)
    cnt = jnp.maximum(jnp.sum(mask, axis=1, keepdims=True), 1.0)
    pooled = summed / cnt                         # exact divide (off the critical path)
    pooled = jnp.tanh(
        jnp.dot(pooled, w("pool_w"), preferred_element_type=f32) + w("pool_b"))

    code_feat = pooled[:n_code]                   # (B*NF, D)  8-aligned slab
    msg_feat = pooled[n_code:]                    # (msg_rows, D)

    # ---- message branch: fc3 ----
    x_msg = jnp.dot(msg_feat, w("fc3_w"), preferred_element_type=f32) + w("fc3_b")

    # ---- code branch: all filter sizes / shifts merged into ONE MXU dot ----
    # wconv packs each K's (K, D, Co) kernel into column block [i*Co:(i+1)*Co] with rows
    # beyond K*D zeroed, so wrap-around rows from the roll contribute exactly zero at
    # valid positions; invalid positions are killed by the -1e30 position mask (tmask).
    xcat = jnp.concatenate(
        [code_feat] + [pltpu.roll(code_feat, shift=n_code - k, axis=0)
                       for k in range(1, kmax)], axis=1)          # (n_code, kmax*D)
    y = jnp.dot(xcat, w("wconv"), preferred_element_type=f32)     # (n_code, n_ks*Co)
    y = y.reshape(B, NF, n_ks * Co) + w("tmask")[None, :, :]
    # relu/maxpool order swap is valid (relu monotone); conv bias hoisted outside the max
    x_code = jnp.maximum(jnp.max(y, axis=1) + w("conv_b"), 0.0)   # (B, n_ks*Co)

    # pad x_code to the 8-aligned msg_rows slab so the head matmuls + final store are
    # full sublane-dense tiles; padded rows carry finite garbage and are sliced off
    # in the wrapper.
    if msg_rows > B:
        x_code = jnp.concatenate(
            [x_code, jnp.zeros((msg_rows - B, n_ks * Co), f32)], axis=0)

    # ---- classifier head (dropout == identity at inference) ----
    # fc1 applied as two half-weight dots, avoiding a lane-axis concat of x_msg/x_code.
    h = jnp.maximum(
        jnp.dot(x_msg, w("fc1w_msg"), preferred_element_type=f32)
        + jnp.dot(x_code, w("fc1w_code"), preferred_element_type=f32)
        + w("fc1_b"), 0.0)                        # (msg_rows, HIDDEN)
    # fc2 is lane-padded to 128 columns and output rows padded to 8 ->
    # fully unmasked lane- and sublane-dense store.
    o_ref[...] = jax.nn.sigmoid(
        jnp.dot(h, w("fc2_w"), preferred_element_type=f32) + w("fc2_b"))


def fused_forward(emb_all, mask_all, wslab, msg_rows):
    n_rows, S, D = emb_all.shape
    n_code = n_rows - msg_rows
    mm_flops = 2 * (n_rows * D * D
                    + msg_rows * D * (NKS * CO)
                    + n_code * (KMAX * D) * (NKS * CO)
                    + 2 * msg_rows * (NKS * CO) * HIDDEN
                    + msg_rows * HIDDEN * OUT_PAD)
    cost = pl.CostEstimate(
        flops=int(mm_flops),
        transcendentals=int(n_rows * D + msg_rows * OUT_PAD),
        bytes_accessed=int(4 * (emb_all.size + mask_all.size + wslab.size
                                + msg_rows * OUT_PAD)))
    return pl.pallas_call(
        functools.partial(_fused_kernel, B=BATCH, NF=NUM_FILE, D=DIM, Co=CO,
                          n_ks=NKS, kmax=KMAX, msg_rows=msg_rows),
        out_shape=jax.ShapeDtypeStruct((msg_rows, OUT_PAD), jnp.float32),
        in_specs=[_vmem()] * 3,
        out_specs=_vmem(),
        compiler_params=pltpu.CompilerParams(vmem_limit_bytes=32 << 20),
        cost_estimate=cost,
    )(emb_all, mask_all, wslab)


# ---------------- parameters ----------------

def init_params(key):
    ks = jax.random.split(key, 11)

    def dense(k, shape, scale=0.1):
        return (scale * jax.random.normal(k, shape)).astype(jnp.float32)

    return {
        "encoder": {
            "embed": dense(ks[0], (VOCAB, DIM)),
            "pool_w": dense(ks[1], (DIM, DIM)),
            "pool_b": dense(ks[2], (1, DIM)),
        },
        "fc3_w": dense(ks[3], (DIM, 3 * CO)),
        "fc3_b": dense(ks[4], (1, 3 * CO)),
        "conv_w": [dense(jax.random.fold_in(ks[5], i), (K, DIM, CO)) for i, K in enumerate(KS)],
        "conv_b": [dense(jax.random.fold_in(ks[6], i), (1, CO)) for i, _ in enumerate(KS)],
        "fc1_w": dense(ks[7], (2 * NKS * CO, HIDDEN)),
        "fc1_b": dense(ks[8], (1, HIDDEN)),
        "fc2_w": dense(ks[9], (HIDDEN, NUM_CLASS)),
        "fc2_b": dense(ks[10], (1, NUM_CLASS)),
    }
    # NOTE: embed_msg / embed_code / convs_msg / convs_code_file exist in __init__
    # but are unused by the reference forward, so they are omitted.


def fuse_params(params):
    """One-time packing of all weights into the single fused-kernel weight slab."""
    # conv weights for all filter sizes -> one (KMAX*D, NKS*CO) matrix (extra rows zero)
    wconv = jnp.zeros((KMAX * DIM, NKS * CO), jnp.float32)
    for i, K in enumerate(KS):
        wconv = wconv.at[:K * DIM, i * CO:(i + 1) * CO].set(
            params["conv_w"][i].reshape(K * DIM, CO))
    conv_b = jnp.concatenate(params["conv_b"], axis=1)                # (1, NKS*CO)

    # position mask: 0 where conv position t is valid for filter K, -1e30 otherwise
    t = jnp.arange(NUM_FILE, dtype=jnp.int32)[:, None]                # (NF, 1)
    k_per_col = jnp.repeat(jnp.asarray(KS, jnp.int32), CO)[None, :]   # (1, NKS*CO)
    tmask = jnp.where(t <= NUM_FILE - k_per_col, 0.0, -1e30).astype(jnp.float32)

    fc1w_msg, fc1w_code = jnp.split(params["fc1_w"], 2, axis=0)       # (3*Co, H) each

    fc2_w = jnp.zeros((HIDDEN, OUT_PAD), jnp.float32).at[:, :NUM_CLASS].set(params["fc2_w"])
    fc2_b = jnp.zeros((1, OUT_PAD), jnp.float32).at[:, :NUM_CLASS].set(params["fc2_b"])

    blocks = {
        "pool_w": params["encoder"]["pool_w"], "pool_b": params["encoder"]["pool_b"],
        "fc3_w": params["fc3_w"], "fc3_b": params["fc3_b"],
        "wconv": wconv, "conv_b": conv_b, "tmask": tmask,
        "fc1w_msg": fc1w_msg, "fc1w_code": fc1w_code, "fc1_b": params["fc1_b"],
        "fc2_w": fc2_w, "fc2_b": fc2_b,
    }
    # pack everything into ONE lane-padded (R, 128) slab at the static offsets in _WLAYOUT
    wslab = jnp.zeros((_WROWS, OUT_PAD), jnp.float32)
    for name, (r0, h, wd) in _WLAYOUT.items():
        a = blocks[name].astype(jnp.float32)
        assert a.shape == (h, wd), (name, a.shape, (h, wd))
        wslab = wslab.at[r0:r0 + h, :wd].set(a)

    return {"embed": params["encoder"]["embed"], "wslab": wslab}


# ---------------- forward ----------------

def codebert4jit_forward(fw, msg_input_ids, msg_input_mask, msg_segment_ids,
                         code_input_ids, code_input_mask, code_segment_ids):
    del msg_segment_ids, code_segment_ids  # unused by the reference forward
    B, NF, S = code_input_ids.shape
    msg_rows = max(8, _round8(B))

    # Pad the msg rows to an 8-aligned slab (mask rows are zero, so padded rows carry
    # finite garbage through the head and are sliced off below).  Code rows first
    # (B*NF rows, 8-aligned), msg rows last, so one kernel call handles all pooling.
    msg_ids_p = jnp.pad(msg_input_ids, ((0, msg_rows - B), (0, 0)))
    msg_mask_p = jnp.pad(msg_input_mask, ((0, msg_rows - B), (0, 0)))

    ids_all = jnp.concatenate([code_input_ids.reshape(B * NF, S), msg_ids_p], axis=0)
    mask_all = jnp.concatenate(
        [code_input_mask.reshape(B * NF, S), msg_mask_p], axis=0).astype(jnp.float32)
    emb_all = fw["embed"][ids_all]                       # (B*NF + msg_rows, S, D)
    # TODO(synk): at real CodeBERT sizes fuse this gather into the kernel via scalar
    # prefetch (ids in SMEM) + per-row DMA from the embed table kept in pl.ANY/HBM.

    out_pad = fused_forward(emb_all, mask_all, fw["wslab"], msg_rows)  # (msg_rows, 128)
    return out_pad[:B, 0]                                # fc2 width == NUM_CLASS == 1


if __name__ == "__main__":
    key = jax.random.PRNGKey(0)
    k_msg, k_code = jax.random.split(key, 2)

    msg_input_ids = jax.random.randint(k_msg, (BATCH, SEQ), 0, VOCAB, dtype=jnp.int32)
    msg_input_mask = jnp.ones((BATCH, SEQ), dtype=jnp.int32)
    msg_segment_ids = jnp.zeros((BATCH, SEQ), dtype=jnp.int32)

    code_input_ids = jax.random.randint(k_code, (BATCH, NUM_FILE, SEQ), 0, VOCAB, dtype=jnp.int32)
    code_input_mask = jnp.ones((BATCH, NUM_FILE, SEQ), dtype=jnp.int32)
    code_segment_ids = jnp.zeros((BATCH, NUM_FILE, SEQ), dtype=jnp.int32)

    params = init_params(jax.random.PRNGKey(1))
    fused = fuse_params(params)   # one-time weight packing, outside the jitted forward

    out = jax.jit(codebert4jit_forward)(fused, msg_input_ids, msg_input_mask,
                                        msg_segment_ids, code_input_ids,
                                        code_input_mask, code_segment_ids)
    jax.block_until_ready(out)
    assert out.shape == (BATCH,) and out.dtype == jnp.float32
    assert bool(jnp.all(jnp.isfinite(out)))
    print("KERNEL_OK")
</pallas_src>

<mosaic_0001>
module attributes {stable_mosaic.version = 11 : i64} {
  func.func @_fused_kernel(%arg0: memref<16x8x32xf32, #tpu.memory_space<vmem>>, %arg1: memref<16x8xf32, #tpu.memory_space<vmem>>, %arg2: memref<336x128xf32, #tpu.memory_space<vmem>>, %arg3: memref<8x128xf32, #tpu.memory_space<vmem>>) attributes {dimension_semantics = [], scalar_prefetch = 0 : i64, scratch_operands = 0 : i64, tpu.core_type = #tpu.core_type<tc>} {
    %c0 = arith.constant 0 : index
    %c0_0 = arith.constant 0 : index
    %c0_1 = arith.constant 0 : index
    %0 = vector.load %arg0[%c0, %c0_0, %c0_1] : memref<16x8x32xf32, #tpu.memory_space<vmem>>, vector<16x8x32xf32>
    %c0_2 = arith.constant 0 : index
    %c0_3 = arith.constant 0 : index
    %1 = vector.load %arg1[%c0_2, %c0_3] : memref<16x8xf32, #tpu.memory_space<vmem>>, vector<16x8xf32>
    %2 = vector.shape_cast %1 : vector<16x8xf32> to vector<16x8x1xf32>
    %3 = vector.broadcast %2 : vector<16x8x1xf32> to vector<16x8x32xf32>
    %4 = arith.mulf %0, %3 : vector<16x8x32xf32>
    %cst = arith.constant dense<0.000000e+00> : vector<16x32xf32>
    %5 = vector.multi_reduction <add>, %4, %cst [1] : vector<16x8x32xf32> to vector<16x32xf32>
    %cst_4 = arith.constant dense<0.000000e+00> : vector<16xf32>
    %6 = vector.multi_reduction <add>, %1, %cst_4 [1] : vector<16x8xf32> to vector<16xf32>
    %7 = vector.shape_cast %6 : vector<16xf32> to vector<16x1xf32>
    %cst_5 = arith.constant 1.000000e+00 : f32
    %8 = vector.broadcast %cst_5 : f32 to vector<16x1xf32>
    %9 = arith.maximumf %7, %8 : vector<16x1xf32>
    %10 = vector.broadcast %9 : vector<16x1xf32> to vector<16x32xf32>
    %11 = arith.divf %5, %10 : vector<16x32xf32>
    %c0_6 = arith.constant 0 : index
    %c0_7 = arith.constant 0 : index
    %12 = vector.load %arg2[%c0_6, %c0_7] : memref<336x128xf32, #tpu.memory_space<vmem>>, vector<32x32xf32>
    %cst_8 = arith.constant dense<0.000000e+00> : vector<16x32xf32>
    %13 = tpu.matmul %11, %12, %cst_8 {dimension_numbers = #tpu.dot_dimension_numbers<[1], [0], [0], [1], [0, 0, 1, 1], [], []>} : vector<16x32xf32>, vector<32x32xf32>, vector<16x32xf32> -> vector<16x32xf32>
    %c32 = arith.constant 32 : index
    %c0_9 = arith.constant 0 : index
    %14 = vector.load %arg2[%c32, %c0_9] : memref<336x128xf32, #tpu.memory_space<vmem>>, vector<1x32xf32>
    %15 = vector.broadcast %14 : vector<1x32xf32> to vector<16x32xf32>
    %16 = arith.addf %13, %15 : vector<16x32xf32>
    %17 = math.tanh %16 : vector<16x32xf32>
    %18 = vector.extract_strided_slice %17 {offsets = [0, 0], sizes = [8, 32], strides = [1, 1]} : vector<16x32xf32> to vector<8x32xf32>
    %19 = vector.extract_strided_slice %17 {offsets = [8, 0], sizes = [8, 32], strides = [1, 1]} : vector<16x32xf32> to vector<8x32xf32>
    %c40 = arith.constant 40 : index
    %c0_10 = arith.constant 0 : index
    %20 = vector.load %arg2[%c40, %c0_10] : memref<336x128xf32, #tpu.memory_space<vmem>>, vector<32x48xf32>
    %cst_11 = arith.constant dense<0.000000e+00> : vector<8x48xf32>
    %21 = tpu.matmul %19, %20, %cst_11 {dimension_numbers = #tpu.dot_dimension_numbers<[1], [0], [0], [1], [0, 0, 1, 1], [], []>} : vector<8x32xf32>, vector<32x48xf32>, vector<8x48xf32> -> vector<8x48xf32>
    %c72 = arith.constant 72 : index
    %c0_12 = arith.constant 0 : index
    %22 = vector.load %arg2[%c72, %c0_12] : memref<336x128xf32, #tpu.memory_space<vmem>>, vector<1x48xf32>
    %23 = vector.broadcast %22 : vector<1x48xf32> to vector<8x48xf32>
    %24 = arith.addf %21, %23 : vector<8x48xf32>
    %c7_i32 = arith.constant 7 : i32
    %25 = tpu.dynamic_rotate %18 by %c7_i32 dim 0 : vector<8x32xf32>, i32 -> vector<8x32xf32>
    %c6_i32 = arith.constant 6 : i32
    %26 = tpu.dynamic_rotate %18 by %c6_i32 dim 0 : vector<8x32xf32>, i32 -> vector<8x32xf32>
    %27 = tpu.concatenate %18, %25, %26 in 1 : vector<8x32xf32>, vector<8x32xf32>, vector<8x32xf32> -> vector<8x96xf32>
    %c80 = arith.constant 80 : index
    %c0_13 = arith.constant 0 : index
    %28 = vector.load %arg2[%c80, %c0_13] : memref<336x128xf32, #tpu.memory_space<vmem>>, vector<96x48xf32>
    %cst_14 = arith.constant dense<0.000000e+00> : vector<8x48xf32>
    %29 = tpu.matmul %27, %28, %cst_14 {dimension_numbers = #tpu.dot_dimension_numbers<[1], [0], [0], [1], [0, 0, 1, 1], [], []>} : vector<8x96xf32>, vector<96x48xf32>, vector<8x48xf32> -> vector<8x48xf32>
    %30 = vector.shape_cast %29 : vector<8x48xf32> to vector<2x4x48xf32>
    %c184 = arith.constant 184 : index
    %c0_15 = arith.constant 0 : index
    %31 = vector.load %arg2[%c184, %c0_15] : memref<336x128xf32, #tpu.memory_space<vmem>>, vector<4x48xf32>
    %32 = vector.shape_cast %31 : vector<4x48xf32> to vector<1x4x48xf32>
    %33 = vector.broadcast %32 : vector<1x4x48xf32> to vector<2x4x48xf32>
    %34 = arith.addf %30, %33 : vector<2x4x48xf32>
    %cst_16 = arith.constant dense<0xFF800000> : vector<2x48xf32>
    %35 = vector.multi_reduction <maximumf>, %34, %cst_16 [1] : vector<2x4x48xf32> to vector<2x48xf32>
    %c176 = arith.constant 176 : index
    %c0_17 = arith.constant 0 : index
    %36 = vector.load %arg2[%c176, %c0_17] : memref<336x128xf32, #tpu.memory_space<vmem>>, vector<1x48xf32>
    %37 = vector.broadcast %36 : vector<1x48xf32> to vector<2x48xf32>
    %38 = arith.addf %35, %37 : vector<2x48xf32>
    %cst_18 = arith.constant 0.000000e+00 : f32
    %39 = vector.broadcast %cst_18 : f32 to vector<2x48xf32>
    %40 = arith.maximumf %38, %39 : vector<2x48xf32>
    %cst_19 = arith.constant 0.000000e+00 : f32
    %41 = vector.broadcast %cst_19 : f32 to vector<6x48xf32>
    %42 = tpu.concatenate %40, %41 in 0 : vector<2x48xf32>, vector<6x48xf32> -> vector<8x48xf32>
    %c192 = arith.constant 192 : index
    %c0_20 = arith.constant 0 : index
    %43 = vector.load %arg2[%c192, %c0_20] : memref<336x128xf32, #tpu.memory_space<vmem>>, vector<48x32xf32>
    %cst_21 = arith.constant dense<0.000000e+00> : vector<8x32xf32>
    %44 = tpu.matmul %24, %43, %cst_21 {dimension_numbers = #tpu.dot_dimension_numbers<[1], [0], [0], [1], [0, 0, 1, 1], [], []>} : vector<8x48xf32>, vector<48x32xf32>, vector<8x32xf32> -> vector<8x32xf32>
    %c240 = arith.constant 240 : index
    %c0_22 = arith.constant 0 : index
    %45 = vector.load %arg2[%c240, %c0_22] : memref<336x128xf32, #tpu.memory_space<vmem>>, vector<48x32xf32>
    %cst_23 = arith.constant dense<0.000000e+00> : vector<8x32xf32>
    %46 = tpu.matmul %42, %45, %cst_23 {dimension_numbers = #tpu.dot_dimension_numbers<[1], [0], [0], [1], [0, 0, 1, 1], [], []>} : vector<8x48xf32>, vector<48x32xf32>, vector<8x32xf32> -> vector<8x32xf32>
    %47 = arith.addf %44, %46 : vector<8x32xf32>
    %c288 = arith.constant 288 : index
    %c0_24 = arith.constant 0 : index
    %48 = vector.load %arg2[%c288, %c0_24] : memref<336x128xf32, #tpu.memory_space<vmem>>, vector<1x32xf32>
    %49 = vector.broadcast %48 : vector<1x32xf32> to vector<8x32xf32>
    %50 = arith.addf %47, %49 : vector<8x32xf32>
    %cst_25 = arith.constant 0.000000e+00 : f32
    %51 = vector.broadcast %cst_25 : f32 to vector<8x32xf32>
    %52 = arith.maximumf %50, %51 : vector<8x32xf32>
    %c296 = arith.constant 296 : index
    %c0_26 = arith.constant 0 : index
    %53 = vector.load %arg2[%c296, %c0_26] : memref<336x128xf32, #tpu.memory_space<vmem>>, vector<32x128xf32>
    %cst_27 = arith.constant dense<0.000000e+00> : vector<8x128xf32>
    %54 = tpu.matmul %52, %53, %cst_27 {dimension_numbers = #tpu.dot_dimension_numbers<[1], [0], [0], [1], [0, 0, 1, 1], [], []>} : vector<8x32xf32>, vector<32x128xf32>, vector<8x128xf32> -> vector<8x128xf32>
    %c328 = arith.constant 328 : index
    %c0_28 = arith.constant 0 : index
    %55 = vector.load %arg2[%c328, %c0_28] : memref<336x128xf32, #tpu.memory_space<vmem>>, vector<1x128xf32>
    %56 = vector.broadcast %55 : vector<1x128xf32> to vector<8x128xf32>
    %57 = arith.addf %54, %56 : vector<8x128xf32>
    %58 = arith.negf %57 : vector<8x128xf32>
    %59 = math.exp %58 : vector<8x128xf32>
    %cst_29 = arith.constant 1.000000e+00 : f32
    %60 = vector.broadcast %cst_29 : f32 to vector<8x128xf32>
    %61 = arith.addf %60, %59 : vector<8x128xf32>
    %62 = arith.divf %60, %61 : vector<8x128xf32>
    %c0_30 = arith.constant 0 : index
    %c0_31 = arith.constant 0 : index
    %63 = vector.load %arg3[%c0_30, %c0_31] : memref<8x128xf32, #tpu.memory_space<vmem>>, vector<8x128xf32>
    tpu.vector_store %arg3[%c0_30, %c0_31], %62 {strides = array<i32>} : memref<8x128xf32, #tpu.memory_space<vmem>>, vector<8x128xf32>,
    return
  }
}

</mosaic_0001>

<bundles_post_ra>
// kernel: codebert4jit_forward.1
= control target key start
LH: loop header
LB: loop body
LE: loop exit
PB: predicated region body
PF: predicated region fallthrough
CT: control target
= control target key end

     0   :  { %vm273_vm0 = vcmask 64512   ;;  %v32_v0 = vlaneseq  ;;  %vm160_vm1 = vcmask 261120   ;;  %vm372_vm2 = vcmask 1041409   ;;  %s1214_s4 = smov 64   ;;  %s1215_s5 = smov 32   ;;  %s1549_s1 = inlined_call_operand.vmem [shape: f32[16,8], index: 1, kind: input, shape index: {}]   ;;  %s1550_s2 = inlined_call_operand.vmem [shape: f32[336,128], index: 2, kind: input, shape index: {}]   ;;  %s1551_s0 = inlined_call_operand.vmem [shape: f32[16,8,32], index: 0, kind: input, shape index: {}]   ;;  %s1552_s3 = inlined_call_operand.vmem [shape: f32[8,128], index: 3, kind: output, shape index: {}]  }
   0x1   :  { %v30_v1 = vld [vmem:[%s1549_s1] sm:$0xff]  ;;  %v31_v2 = vld [vmem:[%s1549_s1 + $0x8] sm:$0xff]  ;;  %v348_v32 = vld [vmem:[%s1550_s2 + $0x10] sm:$0xff]  ;;  %vm375_vm3 = vcmask 1042434   ;;  %vm378_vm4 = vcmask 1043459   ;;  %vm381_vm5 = vcmask 1044484  }
   0x2   :  { %v274_v3 = vsel %vm273_vm0, %v30_v1, 0.0  ;;  %v33_v4 = vshrl.u32 %v32_v0, 7  ;;  %v277_v5 = vsel %vm273_vm0, %v31_v2, 0.0  ;;  %v346_v30 = vld [vmem:[%s1550_s2] sm:$0xff]  ;;  %v347_v31 = vld [vmem:[%s1550_s2 + $0x8] sm:$0xff]  ;;  %v349_v34 = vld [vmem:[%s1550_s2 + $0x18] sm:$0xff] }
   0x3   :  { %275 = vadd.xlane.f32.xlu0 %v274_v3  ;;  %v1110_v33 = vpack.c.bf16 %v347_v31, %v346_v30  ;;  %v1114_v35 = vpack.c.bf16 %v349_v34, %v348_v32  ;;  %v15_v37 = vld [vmem:[%s1551_s0 + $0x8] sm:$0xff]  ;;  %v16_v40 = vld [vmem:[%s1551_s0 + $0x10] sm:$0xff]  ;;  %v14_v42 = vld [vmem:[%s1551_s0] sm:$0xff]  ;;  %vm384_vm6 = vcmask 1045509   ;;  %vm387_vm7 = vcmask 1046534  }
   0x4   :  { %v41_v6 = vsub.s32 1, %v33_v4  ;;  %v48_v7 = vsub.s32 2, %v33_v4  ;;  %v34_v10 = vsub.s32 0, %v33_v4  ;;  %v55_v12 = vsub.s32 3, %v33_v4  ;;  %v17_v45 = vld [vmem:[%s1551_s0 + $0x18] sm:$0xff]  ;;  %v24_v51 = vld [vmem:[%s1551_s0 + $0x50] sm:$0xff] }
   0x5   :  { %v62_v15 = vsub.s32 4, %v33_v4  ;;  %v69_v18 = vsub.s32 5, %v33_v4  ;;  %v76_v21 = vsub.s32 6, %v33_v4  ;;  %v83_v24 = vsub.s32 7, %v33_v4  ;;  %1111 = vmatprep.subr.bf16.mxu0 %v1110_v33  ;;  %v18_v0 = vld [vmem:[%s1551_s0 + $0x20] sm:$0xff]  ;;  %v19_v31 = vld [vmem:[%s1551_s0 + $0x28] sm:$0xff] }
   0x6   :  { %v42_v8 = vrot.slane %v30_v1, %v41_v6  ;;  %v49_v9 = vrot.slane %v30_v1, %v48_v7  ;;  %v35_v11 = vrot.slane %v30_v1, %v34_v10  ;;  %v56_v13 = vrot.slane %v30_v1, %v55_v12  ;;  %1113 = vmatpush3.bf16.msra.mxu0 %v1110_v33  ;;  %v26_v30 = vld [vmem:[%s1551_s0 + $0x60] sm:$0xff] }
   0x7   :  { %278 = vadd.xlane.f32.xlu0 %v277_v5  ;;  %v105_v14 = vrot.slane %v31_v2, %v48_v7  ;;  %v63_v16 = vrot.slane %v30_v1, %v62_v15  ;;  %v98_v17 = vrot.slane %v31_v2, %v41_v6  ;;  %v91_v19 = vrot.slane %v31_v2, %v34_v10  ;;  %v22_v5 = vld [vmem:[%s1551_s0 + $0x40] sm:$0xff] }
   0x8   :  { %44 = vbcast.lane.b32.xlu1 %v42_v8, 256  ;;  %v70_v20 = vrot.slane %v30_v1, %v69_v18  ;;  %v112_v22 = vrot.slane %v31_v2, %v55_v12  ;;  %v77_v23 = vrot.slane %v30_v1, %v76_v21  ;;  %v119_v25 = vrot.slane %v31_v2, %v62_v15 }
   0x9   :  { %v84_v26 = vrot.slane %v30_v1, %v83_v24  ;;  %v126_v27 = vrot.slane %v31_v2, %v69_v18  ;;  %v140_v28 = vrot.slane %v31_v2, %v83_v24  ;;  %v133_v29 = vrot.slane %v31_v2, %v76_v21  ;;  %1115 = vmatprep.subr.bf16.mxu0 %v1114_v35 }
   0xa   :  { %1117 = vmatpush3.bf16.msra.mxu0 %v1114_v35  ;;  %vm390_vm8 = vcmask 1047559   ;;  %vm1212_vm9 = vmmov 0   ;;  %vm580_vm10 = vcmask 523264   ;;  %vm594_vm11 = vcmask 785408  }
   0xb   :  { %vm674_vm12 = vcmask 388096   ;;  %vm703_vm13 = vcmask 1041408   ;;  %vm717_vm14 = vcmask 392192  }
   0xc   :  { %51 = vbcast.lane.b32.xlu1 %v49_v9, 256 }
  0x10   :  { %37 = vbcast.lane.b32.xlu1 %v35_v11, 256 }
  0x14   :  { %58 = vbcast.lane.b32.xlu1 %v56_v13, 256 }
  0x18   :  { %107 = vbcast.lane.b32.xlu1 %v105_v14, 256  ;;  %v25_v14 = vld [vmem:[%s1551_s0 + $0x58] sm:$0xff] }
  0x1c   :  { %65 = vbcast.lane.b32.xlu1 %v63_v16, 256  ;;  %v23_v16 = vld [vmem:[%s1551_s0 + $0x48] sm:$0xff] }
  0x1d   :  { %100 = vbcast.lane.b32.xlu0 %v98_v17, 256 }
  0x20   :  { %93 = vbcast.lane.b32.xlu1 %v91_v19, 256 }
  0x21   :  { %72 = vbcast.lane.b32.xlu0 %v70_v20, 256 }
  0x24   :  { %114 = vbcast.lane.b32.xlu1 %v112_v22, 256 }
  0x25   :  { %79 = vbcast.lane.b32.xlu0 %v77_v23, 256 }
  0x28   :  { %121 = vbcast.lane.b32.xlu1 %v119_v25, 256 }
  0x29   :  { %86 = vbcast.lane.b32.xlu0 %v84_v26, 256 }
  0x2c   :  { %128 = vbcast.lane.b32.xlu1 %v126_v27, 256 }
  0x2d   :  { %142 = vbcast.lane.b32.xlu0 %v140_v28, 256 }
  0x30   :  { %135 = vbcast.lane.b32.xlu1 %v133_v29, 256 }
  0x7a   :  { %v45_v36 = vpop.permute.xlu1 %44 }
  0x7b   :  { %v145_v39 = vmul.f32 %v45_v36, %v15_v37 }
  0x7d   :  { %v168_v43 = vsel %vm160_vm1, %v145_v39, 0.0 }
  0x7e   :  { %v52_v38 = vpop.permute.xlu1 %51  ;;  %v169_v48 = vrot.slane %v168_v43, 4 }
  0x7f   :  { %v146_v44 = vmul.f32 %v52_v38, %v16_v40 }
  0x80   :  { %v170_v55 = vadd.f32 %v169_v48, %v168_v43 }
  0x81   :  { %v175_v50 = vsel %vm160_vm1, %v146_v44, 0.0 }
  0x82   :  { %v38_v41 = vpop.permute.xlu1 %37  ;;  %v176_v56 = vrot.slane %v175_v50, 4  ;;  %v171_v61 = vrot.slane %v170_v55, 2 }
  0x83   :  { %v144_v46 = vmul.f32 %v38_v41, %v14_v42  ;;  %v27_v41 = vld [vmem:[%s1551_s0 + $0x68] sm:$0xff] }
  0x84   :  { %v177_v62 = vadd.f32 %v176_v56, %v175_v50  ;;  %v172_v6 = vadd.f32 %v171_v61, %v170_v55 }
  0x85   :  { %v161_v52 = vsel %vm160_vm1, %v144_v46, 0.0 }
  0x86   :  { %v59_v47 = vpop.permute.xlu1 %58  ;;  %v162_v58 = vrot.slane %v161_v52, 4  ;;  %v178_v7 = vrot.slane %v177_v62, 2  ;;  %v173_v17 = vrot.slane %v172_v6, 1 }
  0x87   :  { %v147_v49 = vmul.f32 %v59_v47, %v17_v45 }
  0x88   :  { %v163_v2 = vadd.f32 %v162_v58, %v161_v52  ;;  %v1286_v18 = vadd.f32 %v178_v7, %v177_v62  ;;  %v1302_v32 = vadd.f32 %v173_v17, %v172_v6 }
  0x89   :  { %v182_v53 = vsel %vm160_vm1, %v147_v49, 0.0  ;;  %v20_v49 = vld [vmem:[%s1551_s0 + $0x30] sm:$0xff] }
  0x8a   :  { %v108_v54 = vpop.permute.xlu1 %107  ;;  %v183_v59 = vrot.slane %v182_v53, 4  ;;  %v164_v11 = vrot.slane %v163_v2, 2  ;;  %v180_v33 = vrot.slane %v1286_v18, 1 }
  0x8b   :  { %v154_v57 = vmul.f32 %v108_v54, %v24_v51 }
  0x8c   :  { %v184_v3 = vadd.f32 %v183_v59, %v182_v53  ;;  %v1291_v24 = vadd.f32 %v164_v11, %v163_v2  ;;  %v28_v59 = vld [vmem:[%s1551_s0 + $0x70] sm:$0xff] }
  0x8d   :  { %v231_v63 = vsel %vm160_vm1, %v154_v57, 0.0 }
  0x8e   :  { %v66_v60 = vpop.permute.xlu1 %65  ;;  %v232_v8 = vrot.slane %v231_v63, 4  ;;  %v185_v12 = vrot.slane %v184_v3, 2  ;;  %v166_v42 = vrot.slane %v1291_v24, 1 }
  0x8f   :  { %v148_v9 = vmul.f32 %v66_v60, %v18_v0 }
  0x90   :  { %v276_v1 = vpop.xlane.xlu0 %275  ;;  %v233_v19 = vadd.f32 %v232_v8, %v231_v63  ;;  %v1293_v25 = vadd.f32 %v185_v12, %v184_v3 }
  0x91   :  { %v189_v20 = vsel %vm160_vm1, %v148_v9, 0.0  ;;  %v1289_v21 = vmax.f32 %v276_v1, 1.0 }
  0x92   :  { %v94_v4 = vpop.permute.xlu1 %93  ;;  %v190_v28 = vrot.slane %v189_v20, 4  ;;  %v234_v34 = vrot.slane %v233_v19, 2  ;;  %v187_v43 = vrot.slane %v1293_v25, 1 }
  0x93   :  { %v152_v13 = vmul.f32 %v94_v4, %v22_v5  ;;  %v288_v39 = vrot.slane %v1289_v21, 5  ;;  %v284_v50 = vrot.slane %v1289_v21, 1  ;;  %v285_v51 = vrot.slane %v1289_v21, 2  ;;  %v21_v5 = vld [vmem:[%s1551_s0 + $0x38] sm:$0xff] }
  0x94   :  { %v279_v10 = vpop.xlane.xlu0 %278  ;;  %v191_v46 = vadd.f32 %v190_v28, %v189_v20  ;;  %v1320_v52 = vadd.f32 %v234_v34, %v233_v19  ;;  %v286_v60 = vrot.slane %v1289_v21, 3  ;;  %v287_v0 = vrot.slane %v1289_v21, 4 }
  0x95   :  { %v217_v26 = vsel %vm160_vm1, %v152_v13, 0.0  ;;  %v1313_v47 = vmax.f32 %v279_v10, 1.0  ;;  %1171 = vrcp.f32 %v288_v39 }
  0x96   :  { %v115_v15 = vpop.permute.xlu1 %114  ;;  %v218_v36 = vrot.slane %v217_v26, 4  ;;  %v192_v1 = vrot.slane %v191_v46, 2 }
  0x97   :  { %v155_v22 = vmul.f32 %v115_v15, %v25_v14  ;;  %v293_v2 = vrot.slane %v1313_v47, 3  ;;  %v291_v3 = vrot.slane %v1313_v47, 1  ;;  %1173 = vrcp.f32 %v1313_v47 }
  0x98   :  { %v101_v23 = vpop.permute.xlu0 %100  ;;  %v219_v56 = vadd.f32 %v218_v36, %v217_v26  ;;  %v294_v12 = vrot.slane %v1313_v47, 4  ;;  %v295_v20 = vrot.slane %v1313_v47, 5  ;;  %v296_v34 = vrot.slane %v1313_v47, 6 }
  0x99   :  { %v153_v27 = vmul.f32 %v101_v23, %v23_v16  ;;  %v238_v37 = vsel %vm160_vm1, %v155_v22, 0.0  ;;  %1175 = vrcp.f32 %v293_v2  ;;  %v289_v23 = vrot.slane %v1289_v21, 6 }
  0x9a   :  { %v122_v29 = vpop.permute.xlu1 %121  ;;  %v239_v53 = vrot.slane %v238_v37, 4  ;;  %v220_v10 = vrot.slane %v219_v56, 2  ;;  %1177 = vrcp.f32 %v291_v3 }
  0x9b   :  { %v224_v35 = vsel %vm160_vm1, %v153_v27, 0.0  ;;  %v156_v44 = vmul.f32 %v122_v29, %v26_v30  ;;  %v29_v29 = vld [vmem:[%s1551_s0 + $0x78] sm:$0xff]  ;;  %1179 = vrcp.f32 %v294_v12 }
  0x9c   :  { %v225_v38 = vrot.slane %v224_v35, 4  ;;  %v73_v40 = vpop.permute.xlu0 %72  ;;  %v240_v6 = vadd.f32 %v239_v53, %v238_v37  ;;  %v221_v36 = vadd.f32 %v220_v10, %v219_v56  ;;  %1181 = vrcp.f32 %v295_v20 }
  0x9d   :  { %v149_v45 = vmul.f32 %v73_v40, %v19_v31  ;;  %v245_v61 = vsel %vm160_vm1, %v156_v44, 0.0  ;;  %1183 = vrcp.f32 %v296_v34  ;;  %v188_v34 = vadd.f32 %v187_v43, %v1293_v25 }
  0x9e   :  { %v129_v48 = vpop.permute.xlu1 %128  ;;  %v226_v57 = vadd.f32 %v225_v38, %v224_v35  ;;  %v246_v13 = vrot.slane %v245_v61, 4  ;;  %v241_v26 = vrot.slane %v240_v6, 2  ;;  %1185 = vrcp.f32 %v1289_v21 }
  0x9f   :  { %v196_v54 = vsel %vm160_vm1, %v149_v45, 0.0  ;;  %v157_v55 = vmul.f32 %v129_v48, %v27_v41  ;;  %v1346_v40 = vpop.eup %1171  ;;  %v1348_v41 = vadd.f32 %v192_v1, %v191_v46  ;;  %1187 = vrcp.f32 %v284_v50 }
  0xa0   :  { %v80_v58 = vpop.permute.xlu0 %79  ;;  %v197_v62 = vrot.slane %v196_v54, 4  ;;  %v227_v11 = vrot.slane %v226_v57, 2  ;;  %v247_v31 = vadd.f32 %v246_v13, %v245_v61  ;;  %v242_v48 = vadd.f32 %v241_v26, %v240_v6 }
  0xa1   :  { %v150_v63 = vmul.f32 %v80_v58, %v20_v49  ;;  %v252_v7 = vsel %vm160_vm1, %v157_v55, 0.0  ;;  %v1351_v55 = vpop.eup %1173  ;;  %1189 = vrcp.f32 %v285_v51  ;;  %v297_v50 = vrot.slane %v1313_v47, 7 }
  0xa2   :  { %v136_v4 = vpop.permute.xlu1 %135  ;;  %v198_v15 = vadd.f32 %v197_v62, %v196_v54  ;;  %v253_v22 = vrot.slane %v252_v7, 4  ;;  %v228_v30 = vadd.f32 %v227_v11, %v226_v57  ;;  %v290_v54 = vrot.slane %v1289_v21, 7 }
  0xa3   :  { %v203_v8 = vsel %vm160_vm1, %v150_v63, 0.0  ;;  %v158_v9 = vmul.f32 %v136_v4, %v28_v59  ;;  %v248_v58 = vrot.slane %v247_v31, 2  ;;  %v222_v59 = vrot.slane %v221_v36, 1 }
  0xa4   :  { %v87_v14 = vpop.permute.xlu0 %86  ;;  %v204_v16 = vrot.slane %v203_v8, 4  ;;  %v199_v37 = vrot.slane %v198_v15, 2  ;;  %v254_v44 = vadd.f32 %v253_v22, %v252_v7  ;;  %v229_v57 = vrot.slane %v228_v30, 1 }
  0xa5   :  { %v259_v17 = vsel %vm160_vm1, %v158_v9, 0.0  ;;  %v151_v19 = vmul.f32 %v87_v14, %v21_v5  ;;  %v243_v2 = vrot.slane %v242_v48, 1  ;;  %v292_v4 = vrot.slane %v1313_v47, 2  ;;  %v1176_v5 = vpop.eup %1175 }
  0xa6   :  { %v260_v27 = vrot.slane %v259_v17, 4  ;;  %v205_v38 = vadd.f32 %v204_v16, %v203_v8  ;;  %v200_v61 = vadd.f32 %v199_v37, %v198_v15  ;;  %v255_v46 = vrot.slane %v254_v44, 2  ;;  %v1178_v9 = vpop.eup %1177 }
  0xa7   :  { %v210_v28 = vsel %vm160_vm1, %v151_v19, 0.0  ;;  %v230_v6 = vadd.f32 %v229_v57, %v228_v30  ;;  %v249_v7 = vadd.f32 %v248_v58, %v247_v31  ;;  %1191 = vrcp.f32 %v286_v60  ;;  %v1180_v12 = vpop.eup %1179 }
  0xa8   :  { %v143_v35 = vpop.permute.xlu0 %142  ;;  %v211_v39 = vrot.slane %v210_v28, 4  ;;  %v261_v49 = vadd.f32 %v260_v27, %v259_v17  ;;  %v206_v62 = vrot.slane %v205_v38, 2  ;;  %v201_v10 = vrot.slane %v200_v61, 1  ;;  %v1182_v60 = vpop.eup %1181 }
  0xa9   :  { %v159_v45 = vmul.f32 %v143_v35, %v29_v29  ;;  %1193 = vrcp.f32 %v287_v0  ;;  %v256_v51 = vadd.f32 %v255_v46, %v254_v44  ;;  %v236_v15 = vrot.slane %v1320_v52, 1  ;;  %v1184_v26 = vpop.eup %1183 }
  0xaa   :  { %v212_v53 = vadd.f32 %v211_v39, %v210_v28  ;;  %v262_v3 = vrot.slane %v261_v49, 2  ;;  %v207_v11 = vadd.f32 %v206_v62, %v205_v38  ;;  %1195 = vrcp.f32 %v289_v23  ;;  %v1186_v30 = vpop.eup %1185 }
  0xab   :  { %v266_v56 = vsel %vm160_vm1, %v159_v45, 0.0  ;;  %v194_v16 = vrot.slane %v1348_v41, 1  ;;  %1197 = vrcp.f32 %v290_v54  ;;  %v223_v19 = vadd.f32 %v222_v59, %v221_v36  ;;  %v1188_v37 = vpop.eup %1187 }
  0xac   :  { %v213_v63 = vrot.slane %v212_v53, 2  ;;  %v267_v1 = vrot.slane %v266_v56, 4  ;;  %v263_v17 = vadd.f32 %v262_v3, %v261_v49  ;;  %v250_v20 = vrot.slane %v249_v7, 1  ;;  %v1190_v44 = vpop.eup %1189 }
  0xad   :  { %1199 = vrcp.f32 %v292_v4  ;;  %v244_v47 = vadd.f32 %v243_v2, %v242_v48  ;;  %v202_v0 = vadd.f32 %v201_v10, %v200_v61  ;;  %v208_v22 = vrot.slane %v207_v11, 1 }
  0xae   :  { %v268_v8 = vadd.f32 %v267_v1, %v266_v56  ;;  %v214_v13 = vadd.f32 %v213_v63, %v212_v53  ;;  %1201 = vrcp.f32 %v297_v50  ;;  %v181_v23 = vadd.f32 %v180_v33, %v1286_v18 }
  0xaf   :  { %v333_v27 = vmul.f32 %v1178_v9, %v230_v6  ;;  %v257_v28 = vrot.slane %v256_v51, 1  ;;  %v167_v31 = vadd.f32 %v166_v42, %v1291_v24  ;;  %v237_v35 = vadd.f32 %v236_v15, %v1320_v52 }
  0xb0   :  { %v269_v14 = vrot.slane %v268_v8, 2  ;;  %v215_v29 = vrot.slane %v214_v13, 1  ;;  %v264_v36 = vrot.slane %v263_v17, 1  ;;  %v195_v18 = vadd.f32 %v194_v16, %v1348_v41 }
  0xb1   :  { %v331_v33 = vmul.f32 %v1351_v55, %v223_v19  ;;  %v251_v38 = vadd.f32 %v250_v20, %v249_v7  ;;  %v337_v45 = vmul.f32 %v1176_v5, %v244_v47  ;;  %v325_v24 = vmul.f32 %v1346_v40, %v202_v0  ;;  %v1192_v25 = vpop.eup %1191 }
  0xb2   :  { %v270_v21 = vadd.f32 %v269_v14, %v268_v8  ;;  %v209_v42 = vadd.f32 %v208_v22, %v207_v11  ;;  %v317_v48 = vmul.f32 %v1188_v37, %v1302_v32  ;;  %v392_v43 = vrot.slane %v333_v27, 7  ;;  %v490_v37 = vld [vmem:[%s1550_s2 + $0x40] sm:$0xff] }
  0xb3   :  { %v258_v52 = vadd.f32 %v257_v28, %v256_v51  ;;  %v216_v49 = vadd.f32 %v215_v29, %v214_v13  ;;  %v319_v53 = vmul.f32 %v1190_v44, %v181_v23  ;;  %v1194_v54 = vpop.eup %1193  ;;  %v265_v57 = vadd.f32 %v264_v36, %v263_v17  ;;  %v584_v44 = vld [vmem:[%s1550_s2 + $0x60] sm:$0xff] }
  0xb4   :  { %v271_v39 = vrot.slane %v270_v21, 1  ;;  %v315_v41 = vmul.f32 %v1186_v30, %v167_v31  ;;  %v321_v58 = vmul.f32 %v1192_v25, %v188_v34  ;;  %v371_v55 = vrot.slane %v317_v48, 7  ;;  %v1196_v56 = vpop.eup %1195  ;;  %v487_v30 = vld [vmem:[%s1550_s2 + $0x28] sm:$0xff]  ;;  %v488_v31 = vld [vmem:[%s1550_s2 + $0x30] sm:$0xff]  ;;  %v489_v34 = vld [vmem:[%s1550_s2 + $0x38] sm:$0xff] }
  0xb5   :  { %v339_v59 = vmul.f32 %v1180_v12, %v251_v38  ;;  %v323_v62 = vmul.f32 %v1194_v54, %v195_v18  ;;  %v374_v46 = vrot.slane %v319_v53, 6  ;;  %v1198_v63 = vpop.eup %1197  ;;  %v327_v40 = vmul.f32 %v1196_v56, %v209_v42  ;;  %v582_v38 = vld [vmem:[%s1550_s2 + $0x50] sm:$0xff]  ;;  %v587_v25 = vld [vmem:[%s1550_s2 + $0x78] sm:$0xff] }
  0xb6   :  { %v272_v61 = vadd.f32 %v271_v39, %v270_v21  ;;  %v373_v1 = vsel %vm372_vm2, %v371_v55, %v315_v41  ;;  %v377_v32 = vrot.slane %v321_v58, 5  ;;  %v383_v2 = vrot.slane %v325_v24, 3  ;;  %v583_v39 = vld [vmem:[%s1550_s2 + $0x58] sm:$0xff]  ;;  %v585_v24 = vld [vmem:[%s1550_s2 + $0x68] sm:$0xff]  ;;  %v586_v48 = vld [vmem:[%s1550_s2 + $0x70] sm:$0xff] }
  0xb7   :  { %v1200_v3 = vpop.eup %1199  ;;  %v341_v4 = vmul.f32 %v1182_v60, %v258_v52  ;;  %v329_v5 = vmul.f32 %v1198_v63, %v216_v49  ;;  %v376_v6 = vsel %vm375_vm3, %v374_v46, %v373_v1  ;;  %v380_v7 = vrot.slane %v323_v62, 4  ;;  %v588_v52 = vld [vmem:[%s1550_s2 + $0x80] sm:$0xff]  ;;  %v589_v49 = vld [vmem:[%s1550_s2 + $0x88] sm:$0xff]  ;;  %v590_v54 = vld [vmem:[%s1550_s2 + $0x90] sm:$0xff] }
  0xb8   :  { %v1202_v8 = vpop.eup %1201  ;;  %v343_v9 = vmul.f32 %v1184_v26, %v265_v57  ;;  %v379_v10 = vsel %vm378_vm4, %v377_v32, %v376_v6  ;;  %v386_v11 = vrot.slane %v327_v40, 2  ;;  %v335_v50 = vmul.f32 %v1200_v3, %v237_v35  ;;  %v591_v57 = vld [vmem:[%s1550_s2 + $0x98] sm:$0xff]  ;;  %v592_v58 = vld [vmem:[%s1550_s2 + $0xa0] sm:$0xff]  ;;  %v593_v55 = vld [vmem:[%s1550_s2 + $0xa8] sm:$0xff] }
  0xb9   :  { %v393_v12 = vsel %vm372_vm2, %v392_v43, %v331_v33  ;;  %v382_v51 = vsel %vm381_vm5, %v380_v7, %v379_v10  ;;  %v389_v13 = vrot.slane %v329_v5, 1  ;;  %v345_v14 = vmul.f32 %v1202_v8, %v272_v61  ;;  %v712_v10 = vld [vmem:[%s1550_s2 + $0xf8] sm:$0xff] }
  0xba   :  { %v398_v15 = vrot.slane %v339_v59, 4  ;;  %v385_v16 = vsel %vm384_vm6, %v383_v2, %v382_v51  ;;  %v394_v17 = vrot.slane %v335_v50, 6  ;;  %v396_v60 = vrot.slane %v337_v45, 5  ;;  %v964_v59 = vld [vmem:[%s1550_s2 + $0x20] ss:$0 sm:$0xff] }
  0xbb   :  { %v400_v19 = vrot.slane %v341_v4, 3  ;;  %v388_v20 = vsel %vm387_vm7, %v386_v11, %v385_v16  ;;  %v402_v21 = vrot.slane %v343_v9, 2  ;;  %v404_v26 = vrot.slane %v345_v14, 1  ;;  %v711_v9 = vld [vmem:[%s1550_s2 + $0xf0] sm:$0xff]  ;;  %v713_v50 = vld [vmem:[%s1550_s2 + $0x100] sm:$0xff]  ;;  %v716_v14 = vld [vmem:[%s1550_s2 + $0x118] sm:$0xff] }
  0xbc   :  { %v391_v47 = vsel %vm390_vm8, %v389_v13, %v388_v20  ;;  %v395_v0 = vsel %vm375_vm3, %v394_v17, %v393_v12  ;;  %v1211_v35 = vmov 0.0|0.0   ;;  %v1119_v36 = vpack.c.bf16 %v488_v31, %v487_v30  ;;  %v714_v12 = vld [vmem:[%s1550_s2 + $0x108] sm:$0xff]  ;;  %v715_v13 = vld [vmem:[%s1550_s2 + $0x110] sm:$0xff]  ;;  %v671_v16 = vld [vmem:[%s1550_s2 + $0xb8] sm:$0xf] }
  0xbd   :  { %1028 = vmatprep.mubr.msk.f32.mxu0 %vm160_vm1, %v391_v47  ;;  %v397_v22 = vsel %vm378_vm4, %v396_v60, %v395_v0  ;;  %1118 = vmatprep.subr.bf16.mxu1 %v1211_v35  ;;  %v1213_v18 = vmov 0.0   ;;  %v1122_v33 = vpack.c.bf16 %v490_v37, %v489_v34  ;;  %v1125_v45 = vpack.c.bf16 %v583_v39, %v582_v38 }
  0xbe   :  { %v399_v23 = vsel %vm381_vm5, %v398_v15, %v397_v22  ;;  %1039 = vmatprep.mubr.msk.f32.mxu1 %vm1212_vm9, %v1213_v18  ;;  %1124 = vmatprep.subr.bf16.mxu0 %v1211_v35  ;;  %v1128_v42 = vpack.c.bf16 %v585_v24, %v584_v44  ;;  %v1131_v43 = vpack.c.bf16 %v587_v25, %v586_v48  ;;  %v705_v24 = vld [vmem:[%s1550_s2 + $0xc0] sm:$0xff] }
  0xbf   :  { %v401_v27 = vsel %vm384_vm6, %v400_v19, %v399_v23  ;;  %1120 = vmatpush3.bf16.msra.mxu1 %v1119_v36  ;;  %v1134_v53 = vpack.c.bf16 %v589_v49, %v588_v52  ;;  %v1137_v41 = vpack.c.bf16 %v591_v57, %v590_v54  ;;  %v1140_v56 = vpack.c.bf16 %v593_v55, %v592_v58  ;;  %v707_v49 = vld [vmem:[%s1550_s2 + $0xd0] sm:$0xff]  ;;  %v710_v58 = vld [vmem:[%s1550_s2 + $0xe8] sm:$0xff] }
  0xc0   :  { %v403_v28 = vsel %vm387_vm7, %v402_v21, %v401_v27  ;;  %1121 = vmatprep.subr.bf16.mxu1 %v1211_v35  ;;  %v1143_v11 = vpack.c.bf16 %v712_v10, %v711_v9  ;;  %v1146_v51 = vpack.c.bf16 %v714_v12, %v713_v50  ;;  %v1149_v15 = vpack.c.bf16 %v716_v14, %v715_v13 }
  0xc1   :  { %v405_v29 = vsel %vm390_vm8, %v404_v26, %v403_v28 }
  0xc2   :  { %1029 = vmatmul.mubr.msk.f32.vlgmr.msra.gmra.mrb[0].mxu0 %vm160_vm1, %v405_v29 }
  0xc3   :  { %1066 = vmatprep.mubr.msk.f32.mxu0 %vm1212_vm9, %v1213_v18  ;;  %1123 = vmatpush3.bf16.msra.mxu1 %v1122_v33  ;;  %v970_v33 = vld [vmem:[%s1550_s2 + $0xb0] ss:$0 sm:$0xff] }
  0xc4   :  { %1142 = vmatprep.subr.bf16.mxu1 %v1211_v35  ;;  %1126 = vmatpush3.bf16.msra.mxu0 %v1125_v45 }
  0xc5   :  { %1127 = vmatprep.subr.bf16.mxu0 %v1211_v35 }
  0xc8   :  { %1129 = vmatpush3.bf16.msra.mxu0 %v1128_v42  ;;  %v706_v42 = vld [vmem:[%s1550_s2 + $0xc8] sm:$0xff] }
  0xc9   :  { %1130 = vmatprep.subr.bf16.mxu0 %v1211_v35 }
  0xcc   :  { %1132 = vmatpush3.bf16.msra.mxu0 %v1131_v43  ;;  %v1152_v43 = vpack.c.bf16 %v706_v42, %v705_v24 }
  0xcd   :  { %1133 = vmatprep.subr.bf16.mxu0 %v1211_v35 }
  0xd0   :  { %1135 = vmatpush3.bf16.msra.mxu0 %v1134_v53  ;;  %v708_v53 = vld [vmem:[%s1550_s2 + $0xd8] sm:$0xff] }
  0xd1   :  { %1136 = vmatprep.subr.bf16.mxu0 %v1211_v35  ;;  %v1155_v57 = vpack.c.bf16 %v708_v53, %v707_v49 }
  0xd4   :  { %1138 = vmatpush3.bf16.msra.mxu0 %v1137_v41  ;;  %v709_v41 = vld [vmem:[%s1550_s2 + $0xe0] sm:$0xff] }
  0xd5   :  { %1139 = vmatprep.subr.bf16.mxu0 %v1211_v35  ;;  %v1158_v55 = vpack.c.bf16 %v710_v58, %v709_v41 }
  0xd8   :  { %1141 = vmatpush3.bf16.msra.mxu0 %v1140_v56  ;;  %v967_v56 = vld [vmem:[%s1550_s2 + $0x48] ss:$0 sm:$0xff] }
  0xd9   :  { %1160 = vmatprep.subr.bf16.mxu0 %v1211_v35 }
 0x195   :  { %v1030_v61 = vpop.f32.mrb[0].mxu0 }
 0x196   :  { %v482_v62 = vadd.f32 %v1030_v61, %v964_v59  ;;  %v476_v46 = vpop.f32.mrb[1].mxu0  ;;  %v872_v61 = vld [vmem:[%s1550_s2 + $0x130] sm:$0xff] }
 0x197   :  { %v477_v63 = vadd.f32 %v964_v59, %v476_v46  ;;  %v871_v59 = vld [vmem:[%s1550_s2 + $0x128] sm:$0xff] }
 0x198   :  { %1203 = vtanh.f32 %v482_v62  ;;  %v873_v62 = vld [vmem:[%s1550_s2 + $0x138] sm:$0xff]  ;;  %v1161_v46 = vpack.c.bf16 %v872_v61, %v871_v59 }
 0x199   :  { %1205 = vtanh.f32 %v477_v63  ;;  %v874_v63 = vld [vmem:[%s1550_s2 + $0x140] sm:$0xff] }
 0x1a2   :  { %v1204_v40 = vpop.eup %1203 }
 0x1a3   :  { %v1206_v1 = vpop.eup %1205  ;;  %1040 = vmatmul.mubr.msk.f32.vlgmr.msra.gmra.mrb[0].mxu1 %vm160_vm1, %v1204_v40  ;;  %v1164_v40 = vpack.c.bf16 %v874_v63, %v873_v62 }
 0x1a4   :  { %v570_v32 = vrot.slane %v1206_v1, 2  ;;  %v569_v2 = vrot.slane %v1206_v1, 1  ;;  %1081 = vmatprep.mubr.msk.f32.mxu1 %vm1212_vm9, %v1213_v18  ;;  %1144 = vmatpush3.bf16.msra.mxu1 %v1143_v11 }
 0x1a5   :  { %1145 = vmatprep.subr.bf16.mxu1 %v1211_v35 }
 0x1a6   :  { %576 = vrot.lane.b32.xlu0 %v570_v32, %s1214_s4  ;;  %572 = vrot.lane.b32.xlu1 %v569_v2, %s1215_s5 }
 0x1a8   :  { %1147 = vmatpush3.bf16.msra.mxu1 %v1146_v51 }
 0x1a9   :  { %1148 = vmatprep.subr.bf16.mxu1 %v1211_v35 }
 0x1ac   :  { %1150 = vmatpush3.bf16.msra.mxu1 %v1149_v15 }
 0x1ad   :  { %1151 = vmatprep.subr.bf16.mxu1 %v1211_v35 }
 0x218   :  { %v577_v3 = vpop.permute.xlu0 %576  ;;  %v573_v4 = vpop.permute.xlu1 %572 }
 0x219   :  { %v579_v5 = vsel %vm160_vm1, %v1206_v1, %v573_v4 }
 0x21a   :  { %v581_v6 = vsel %vm580_vm10, %v579_v5, %v577_v3  ;;  %v973_v3 = vld [vmem:[%s1550_s2 + $0x120] ss:$0 sm:$0xff] }
 0x21b   :  { %1067 = vmatmul.mubr.msk.f32.vlgmr.msra.gmra.mrb[2].mxu0 %vm594_vm11, %v581_v6 }
 0x21c   :  { %1107 = vmatprep.mubr.msk.f32.mxu0 %vm1212_vm9, %v1213_v18  ;;  %1162 = vmatpush3.bf16.msra.mxu0 %v1161_v46 }
 0x21d   :  { %1163 = vmatprep.subr.bf16.mxu0 %v1211_v35 }
 0x220   :  { %1165 = vmatpush3.bf16.msra.mxu0 %v1164_v40 }
 0x276   :  { %v1468_v7 = vpop.f32.mrb[0].mxu1 }
 0x277   :  { %v1041_v8 = vpop.f32.mrb[1].mxu1 }
 0x278   :  { %v974_v8 = vld [vmem:[%s1550_s2 + $0x148] ss:$0 sm:$0xff] }
 0x2ee   :  { %v664_v17 = vpop.f32.mrb[2].mxu0 }
 0x2ef   :  { %v669_v60 = vcombine.high %v664_v17, %v664_v17  ;;  %v672_v19 = vadd.f32 %v671_v16, %v664_v17  ;;  %v1068_v20 = vpop.f32.mrb[3].mxu0 }
 0x2f1   :  { %v673_v21 = vadd.f32 %v671_v16, %v669_v60  ;;  %v675_v47 = vsel %vm674_vm12, %v672_v19, -inf }
 0x2f2   :  { %v676_v0 = vrot.slane %v675_v47, 4 }
 0x2f3   :  { %v682_v22 = vsel %vm674_vm12, %v673_v21, -inf }
 0x2f4   :  { %v677_v26 = vmax.f32 %v675_v47, %v676_v0  ;;  %v683_v23 = vrot.slane %v682_v22, 4 }
 0x2f6   :  { %v678_v27 = vrot.slane %v677_v26, 2  ;;  %v684_v28 = vmax.f32 %v682_v22, %v683_v23 }
 0x2f8   :  { %v679_v29 = vmax.f32 %v677_v26, %v678_v27  ;;  %v685_v30 = vrot.slane %v684_v28, 2 }
 0x2fa   :  { %v680_v31 = vrot.slane %v679_v29, 1  ;;  %v686_v34 = vmax.f32 %v684_v28, %v685_v30 }
 0x2fc   :  { %v681_v36 = vmax.f32 %v679_v29, %v680_v31  ;;  %v687_v37 = vrot.slane %v686_v34, 1 }
 0x2fe   :  { %v688_v38 = vmax.f32 %v686_v34, %v687_v37  ;;  %v694_v39 = vadd.f32 %v970_v33, %v681_v36 }
 0x300   :  { %v695_v44 = vadd.f32 %v970_v33, %v688_v38  ;;  %v696_v48 = vmax.f32 %v694_v39, 0.0 }
 0x302   :  { %v697_v45 = vmax.f32 %v695_v44, 0.0 }
 0x304   :  { %v700_v25 = vrot.slane %v697_v45, 7 }
 0x306   :  { %v701_v52 = vsel %vm372_vm2, %v700_v25, %v696_v48 }
 0x307   :  { %v704_v54 = vsel %vm703_vm13, %v701_v52, 0.0 }
 0x308   :  { %1082 = vmatmul.mubr.msk.f32.vlgmr.msra.gmra.mrb[2].mxu1 %vm717_vm14, %v704_v54 }
 0x309   :  { %1153 = vmatpush3.bf16.msra.mxu1 %v1152_v43  ;;  %1096 = vmatprep.mubr.msk.f32.mxu1 %vm1212_vm9, %v1213_v18  ;;  %v566_v18 = vadd.f32 %v967_v56, %v1468_v7 }
 0x30a   :  { %1154 = vmatprep.subr.bf16.mxu1 %v1211_v35 }
 0x30d   :  { %1156 = vmatpush3.bf16.msra.mxu1 %v1155_v57 }
 0x30e   :  { %1157 = vmatprep.subr.bf16.mxu1 %v1211_v35 }
 0x311   :  { %1159 = vmatpush3.bf16.msra.mxu1 %v1158_v55 }
 0x314   :  { %1097 = vmatmul.mubr.msk.f32.vlgmr.msra.gmra.mrb[4].mxu1 %vm717_vm14, %v566_v18 }
 0x3db   :  { %v787_v1 = vpop.f32.mrb[2].mxu1 }
 0x3dc   :  { %v1083_v32 = vpop.f32.mrb[3].mxu1 }
 0x3e7   :  { %v860_v2 = vpop.f32.mrb[4].mxu1 }
 0x3e8   :  { %v861_v4 = vadd.f32 %v860_v2, %v787_v1  ;;  %v1098_v5 = vpop.f32.mrb[5].mxu1 }
 0x3ea   :  { %v869_v6 = vadd.f32 %v973_v3, %v861_v4 }
 0x3ec   :  { %v870_v7 = vmax.f32 %v869_v6, 0.0 }
 0x3ee   :  { %1108 = vmatmul.mubr.msk.f32.vlgmr.msra.gmra.mrb[4].mxu0 %vm160_vm1, %v870_v7 }
 0x4c1   :  { %v949_v9 = vpop.f32.mrb[4].mxu0 }
 0x4c2   :  { %v950_v35 = vadd.f32 %v974_v8, %v949_v9  ;;  %v1109_v10 = vpop.f32.mrb[5].mxu0 }
 0x4c4   :  { %v976_v11 = vmul.f32 -1.442695, %v950_v35 }
 0x4c6   :  { %1207 = vpow2.f32 %v976_v11 }
 0x4d0   :  { %v1208_v50 = vpop.eup %1207 }
 0x4d1   :  { %v956_v12 = vadd.f32 1.0, %v1208_v50 }
 0x4d3   :  { %1209 = vrcp.f32 %v956_v12 }
 0x4dd   :  { %v1210_v51 = vpop.eup %1209 }
 0x4de   :  { %959 = vst [vmem:[%s1552_s3] sm:$0xff] %v1210_v51 }

</bundles_post_ra>
